<compile_context>
chip_gen: v7x
topology: tpu7x:2x2x1
jax: 0.10.0
libtpu: 0.0.40
codegen_flags: <defaults>
</compile_context>

<pallas_src>
import functools

import jax
import jax.numpy as jnp
from jax.experimental import pallas as pl
from jax.experimental.pallas import tpu as pltpu


def _round_up(x, m):
    return (x + m - 1) // m * m


def _fused_graphsage_kernel(n_pad, tm, tk, num_layers, a_resident,
                            a_ref, x_ref, wl_ref, wr_ref, b_ref, o_ref,
                            h_ref, acc_ref):
    """Fused multi-layer SAGE forward.

    Grid: (layer, row_tile, k_tile), reduction (k) innermost.  h_ref is a
    (2*n_pad, f_pad) bf16 ping-pong activation buffer; acc_ref is a (tm, f_pad)
    f32 aggregation accumulator.  When `a_resident`, the whole padded A lives in
    VMEM and the k axis has extent 1 (tk == n_pad).
    """
    l = pl.program_id(0)   # layer
    i = pl.program_id(1)   # output row tile
    k = pl.program_id(2)   # reduction (neighbor / A-column) tile
    nk = pl.num_programs(2)

    # Stage X into slot 0 of the ping-pong buffer tile-by-tile during layer 0's
    # first row pass (x_ref holds exactly tile k then; afterwards its block index
    # is pinned to 0 by the index_map so it is never re-fetched from HBM).
    @pl.when((l == 0) & (i == 0))
    def _():
        h_ref[pl.ds(pl.multiple_of(k * tk, tk), tk), :] = x_ref[...]

    # Zero the f32 accumulator at the start of every reduction.
    @pl.when(k == 0)
    def _():
        acc_ref[...] = jnp.zeros_like(acc_ref)

    prev_base = (l % 2) * n_pad        # rows holding this layer's input H
    cur_base = ((l + 1) % 2) * n_pad   # rows receiving this layer's output

    if a_resident:
        # A fully resident in VMEM: dynamic slice only along the sublane (row)
        # dim; lanes stay dense.  One dot does the whole contraction (nk == 1).
        a_tile = a_ref[pl.ds(pl.multiple_of(i * tm, tm), tm), :]
    else:
        a_tile = a_ref[...]            # streamed (tm, tk) tile

    # Mean-aggregation partial sum: acc += A[i, k] @ H_prev[k]  (bf16 MXU, f32 acc)
    hk = h_ref[pl.ds(pl.multiple_of(prev_base + k * tk, tk), tk), :]
    acc_ref[...] += jnp.dot(a_tile, hk, preferred_element_type=jnp.float32)

    # Finalize this row tile: neighbor + root transforms + bias.
    @pl.when(k == nk - 1)
    def _():
        hi = h_ref[pl.ds(pl.multiple_of(prev_base + i * tm, tm), tm), :]
        agg = acc_ref[...].astype(jnp.bfloat16)
        out = (
            jnp.dot(agg, wl_ref[...], preferred_element_type=jnp.float32)
            + jnp.dot(hi, wr_ref[...], preferred_element_type=jnp.float32)
            + b_ref[...]
        )

        # Hidden layers: ReLU, feed next layer (stays in VMEM, never touches HBM).
        # Padded rows pick up relu(bias) here; harmless because the padded
        # *columns* of A are zero, so they never contaminate real rows.
        @pl.when(l < num_layers - 1)
        def _():
            h_ref[pl.ds(pl.multiple_of(cur_base + i * tm, tm), tm), :] = (
                jnp.maximum(out, 0.0).astype(jnp.bfloat16))

        # Only the last layer writes logits.  The output block (i, 0) is revisited
        # every layer; this is correct only because the layer axis is outermost.
        @pl.when(l == num_layers - 1)
        def _():
            o_ref[...] = out.astype(o_ref.dtype)


def graphsage_forward(params, A, X, *, tm=256, tk=256,
                      vmem_limit_bytes=48 * 1024 * 1024):
    """Fused Pallas forward for 3 SAGEConv layers (logits returned, no softmax)."""
    num_layers = len(params)
    N, f_in = X.shape
    feat_dims = [f_in] + [wl.shape[1] for (wl, _, _) in params]
    n_classes = feat_dims[-1]
    f_pad = _round_up(max(feat_dims + [128]), 128)     # lane-dense feature width
    n_pad = _round_up(N, max(tm, tk))

    # Resident-A fast path when the padded bf16 adjacency fits a conservative
    # (v7x-safe) VMEM budget even double-buffered.  Collapses the k axis.
    a_resident = (2 * n_pad * n_pad * 2) <= 16 * 1024 * 1024
    if a_resident:
        tk = n_pad
    assert n_pad % tm == 0 and n_pad % tk == 0

    # Pad + cast at the call boundary (zero padding keeps the math exact).
    a_p = jnp.pad(A, ((0, n_pad - N), (0, n_pad - N))).astype(jnp.bfloat16)
    x_p = jnp.pad(X, ((0, n_pad - N), (0, f_pad - f_in))).astype(jnp.bfloat16)

    wl_p = jnp.zeros((num_layers, f_pad, f_pad), jnp.bfloat16)
    wr_p = jnp.zeros((num_layers, f_pad, f_pad), jnp.bfloat16)
    b_p = jnp.zeros((num_layers, 1, f_pad), jnp.float32)
    for layer, (wl, wr, b) in enumerate(params):
        fi, fo = wl.shape
        wl_p = wl_p.at[layer, :fi, :fo].set(wl.astype(jnp.bfloat16))
        wr_p = wr_p.at[layer, :fi, :fo].set(wr.astype(jnp.bfloat16))
        b_p = b_p.at[layer, 0, :fo].set(jnp.reshape(b, (-1,)).astype(jnp.float32))

    grid = (num_layers, n_pad // tm, n_pad // tk)
    kernel = functools.partial(_fused_graphsage_kernel, n_pad, tm, tk,
                               num_layers, a_resident)

    if a_resident:
        a_spec = pl.BlockSpec((n_pad, n_pad), lambda l, i, k: (0, 0))   # fetched once
    else:
        a_spec = pl.BlockSpec((tm, tk), lambda l, i, k: (i, k))         # streamed/layer

    # X is only needed while being staged into the VMEM ping-pong buffer (layer 0,
    # row tile 0); afterwards its block index is pinned to 0 so the pipeliner never
    # re-fetches it and only one small (tk, f_pad) double-buffer is allocated.
    def x_index_map(l, i, k):
        return (jnp.where(jnp.logical_and(l == 0, i == 0), k, 0), 0)

    # Advisory cost: per layer one N^2*F aggregation + two N*F*F transforms.
    flops = num_layers * (2 * n_pad * n_pad * f_pad + 4 * n_pad * f_pad * f_pad)
    a_reads = 1 if a_resident else num_layers
    bytes_accessed = (
        a_reads * n_pad * n_pad * 2          # A (once if resident, else per layer)
        + n_pad * f_pad * 2                  # X (staged once)
        + (wl_p.size + wr_p.size) * 2
        + b_p.size * 4
        + n_pad * f_pad * 4                  # logits writeback
    )

    out_p = pl.pallas_call(
        kernel,
        out_shape=jax.ShapeDtypeStruct((n_pad, f_pad), jnp.float32),
        grid_spec=pltpu.PrefetchScalarGridSpec(
            num_scalar_prefetch=0,
            grid=grid,
            in_specs=[
                a_spec,                                                   # A
                pl.BlockSpec((tk, f_pad), x_index_map),                   # X (staged)
                pl.BlockSpec((None, f_pad, f_pad), lambda l, i, k: (l, 0, 0)),  # W_l
                pl.BlockSpec((None, f_pad, f_pad), lambda l, i, k: (l, 0, 0)),  # W_r
                pl.BlockSpec((None, 1, f_pad), lambda l, i, k: (l, 0, 0)),      # bias
            ],
            out_specs=pl.BlockSpec((tm, f_pad), lambda l, i, k: (i, 0)),
            scratch_shapes=[
                pltpu.VMEM((2 * n_pad, f_pad), jnp.bfloat16),  # activation ping-pong
                pltpu.VMEM((tm, f_pad), jnp.float32),          # f32 accumulator
            ],
        ),
        compiler_params=pltpu.CompilerParams(
            dimension_semantics=("arbitrary", "arbitrary", "arbitrary"),
            vmem_limit_bytes=vmem_limit_bytes,
        ),
        cost_estimate=pl.CostEstimate(
            flops=flops, transcendentals=0, bytes_accessed=bytes_accessed),
    )(a_p, x_p, wl_p, wr_p, b_p)

    return out_p[:N, :n_classes]


def mean_aggregation_matrix(edge_index, num_nodes):
    """Row-normalized adjacency: A[dst, src] = 1 / in_degree(dst) (0 if no in-edges)."""
    src = edge_index[0]
    dst = edge_index[1]
    A = jnp.zeros((num_nodes, num_nodes), jnp.float32).at[dst, src].add(1.0)
    deg = A.sum(axis=1, keepdims=True)
    return jnp.where(deg > 0, A / jnp.maximum(deg, 1.0), 0.0)


def init_sage_params(key, f_in, f_out):
    """Deterministic glorot-style init for one SAGEConv (W_l, W_r, bias)."""
    k1, k2 = jax.random.split(key)
    scale = jnp.sqrt(6.0 / (f_in + f_out)).astype(jnp.float32)
    Wl = jax.random.uniform(k1, (f_in, f_out), jnp.float32, -scale, scale)
    Wr = jax.random.uniform(k2, (f_in, f_out), jnp.float32, -scale, scale)
    b = jnp.zeros((1, f_out), jnp.float32)
    return Wl, Wr, b


def graphsage_reference(params, A, X):
    """Pure-JAX f32 reference with identical semantics."""
    h = X
    for idx, (wl, wr, b) in enumerate(params):
        agg = A @ h
        h_new = agg @ wl + h @ wr + b
        if idx < len(params) - 1:
            h_new = jax.nn.relu(h_new)
        h = h_new
    return h


if __name__ == "__main__":
    # Small synthetic graph: 200 nodes, 16 input features, hidden=32, 8 classes.
    num_nodes = 200
    in_feats = 16
    hidden_layers = 32
    classes_count = 8
    num_edges = 800

    key = jax.random.PRNGKey(0)
    kx, ke1, ke2, kp1, kp2, kp3 = jax.random.split(key, 6)

    X = jax.random.normal(kx, (num_nodes, in_feats), jnp.float32)
    src = jax.random.randint(ke1, (num_edges,), 0, num_nodes)
    dst = jax.random.randint(ke2, (num_edges,), 0, num_nodes)
    edge_index = jnp.stack([src, dst], axis=0)  # [2, E], PyG convention

    A = mean_aggregation_matrix(edge_index, num_nodes)

    params = (
        init_sage_params(kp1, in_feats, hidden_layers),
        init_sage_params(kp2, hidden_layers, hidden_layers),
        init_sage_params(kp3, hidden_layers, classes_count),
    )

    fwd = jax.jit(graphsage_forward)
    out = jax.block_until_ready(fwd(params, A, X))

    assert out.shape == (num_nodes, classes_count)
    assert jnp.all(jnp.isfinite(out))

    # Loose check against the f32 reference (kernel runs A/X/W in bf16).
    ref = graphsage_reference(params, A, X)
    err = float(jnp.max(jnp.abs(out - ref)) / (jnp.max(jnp.abs(ref)) + 1e-6))
    assert err < 1e-1, f"mismatch vs reference: normalized max-abs err {err:.3e}"

    print("KERNEL_OK")
</pallas_src>

<mosaic_0001>
module attributes {stable_mosaic.version = 11 : i64} {
  func.func @_fused_graphsage_kernel(%arg0: i32, %arg1: i32, %arg2: i32, %arg3: memref<256x256xbf16, #tpu.memory_space<vmem>>, %arg4: memref<256x128xbf16, #tpu.memory_space<vmem>>, %arg5: memref<1x128x128xbf16, #tpu.memory_space<vmem>>, %arg6: memref<1x128x128xbf16, #tpu.memory_space<vmem>>, %arg7: memref<1x1x128xf32, #tpu.memory_space<vmem>>, %arg8: memref<256x128xf32, #tpu.memory_space<vmem>>, %arg9: memref<512x128xbf16, #tpu.memory_space<vmem>>, %arg10: memref<256x128xf32, #tpu.memory_space<vmem>>) attributes {dimension_semantics = [#tpu.dimension_semantics<arbitrary>, #tpu.dimension_semantics<arbitrary>, #tpu.dimension_semantics<arbitrary>], iteration_bounds = array<i64: 3, 1, 1>, scalar_prefetch = 0 : i64, scratch_operands = 2 : i64, tpu.core_type = #tpu.core_type<tc>, window_params = [{pipeline_mode = #tpu.pipeline_mode<synchronous>, transform_indices = @transform_0, window_bounds = array<i64: 256, 256>}, {transform_indices = @transform_1, window_bounds = array<i64: 256, 128>}, {transform_indices = @transform_2, window_bounds = array<i64: 1, 128, 128>}, {transform_indices = @transform_3, window_bounds = array<i64: 1, 128, 128>}, {transform_indices = @transform_4, window_bounds = array<i64: 1, 1, 128>}, {transform_indices = @transform_5, window_bounds = array<i64: 256, 128>}]} {
    %c0_i32 = arith.constant 0 : i32
    %0 = arith.cmpi eq, %arg0, %c0_i32 : i32
    %c0_i32_0 = arith.constant 0 : i32
    %1 = arith.cmpi eq, %arg1, %c0_i32_0 : i32
    %2 = arith.andi %0, %1 : i1
    %3 = arith.extui %2 : i1 to i32
    %c0_i32_1 = arith.constant 0 : i32
    %4 = arith.cmpi ne, %3, %c0_i32_1 : i32
    scf.if %4 {
      %c0_25 = arith.constant 0 : index
      %c0_26 = arith.constant 0 : index
      %47 = vector.load %arg4[%c0_25, %c0_26] : memref<256x128xbf16, #tpu.memory_space<vmem>>, vector<256x128xbf16>
      %c256_i32_27 = arith.constant 256 : i32
      %48 = arith.muli %arg2, %c256_i32_27 : i32
      %49 = tpu.assume_multiple %48, 256 : i32
      %50 = arith.index_cast %49 : i32 to index
      %c0_28 = arith.constant 0 : index
      %51 = vector.load %arg9[%50, %c0_28] : memref<512x128xbf16, #tpu.memory_space<vmem>>, vector<256x128xbf16>
      tpu.vector_store %arg9[%50, %c0_28], %47 {strides = array<i32>} : memref<512x128xbf16, #tpu.memory_space<vmem>>, vector<256x128xbf16>,
    } else {
    }
    %c0_i32_2 = arith.constant 0 : i32
    %5 = arith.cmpi eq, %arg2, %c0_i32_2 : i32
    %6 = arith.extui %5 : i1 to i32
    %c0_i32_3 = arith.constant 0 : i32
    %7 = arith.cmpi ne, %6, %c0_i32_3 : i32
    scf.if %7 {
      %cst_25 = arith.constant 0.000000e+00 : f32
      %47 = vector.broadcast %cst_25 : f32 to vector<256x128xf32>
      %c0_26 = arith.constant 0 : index
      %c0_27 = arith.constant 0 : index
      %48 = vector.load %arg10[%c0_26, %c0_27] : memref<256x128xf32, #tpu.memory_space<vmem>>, vector<256x128xf32>
      tpu.vector_store %arg10[%c0_26, %c0_27], %47 {strides = array<i32>} : memref<256x128xf32, #tpu.memory_space<vmem>>, vector<256x128xf32>,
    } else {
    }
    %c2_i32 = arith.constant 2 : i32
    %c0_i32_4 = arith.constant 0 : i32
    %8 = arith.cmpi eq, %c2_i32, %c0_i32_4 : i32
    %c1_i32 = arith.constant 1 : i32
    %9 = arith.select %8, %c1_i32, %c2_i32 : i32
    %10 = arith.remsi %arg0, %9 : i32
    %c0_i32_5 = arith.constant 0 : i32
    %11 = arith.cmpi ne, %10, %c0_i32_5 : i32
    %c0_i32_6 = arith.constant 0 : i32
    %12 = arith.cmpi slt, %10, %c0_i32_6 : i32
    %c0_i32_7 = arith.constant 0 : i32
    %13 = arith.cmpi slt, %9, %c0_i32_7 : i32
    %14 = arith.xori %12, %13 : i1
    %15 = arith.andi %14, %11 : i1
    %16 = arith.addi %10, %9 : i32
    %17 = arith.select %15, %16, %10 : i32
    %c256_i32 = arith.constant 256 : i32
    %18 = arith.muli %17, %c256_i32 : i32
    %c1_i32_8 = arith.constant 1 : i32
    %19 = arith.addi %arg0, %c1_i32_8 : i32
    %c2_i32_9 = arith.constant 2 : i32
    %c0_i32_10 = arith.constant 0 : i32
    %20 = arith.cmpi eq, %c2_i32_9, %c0_i32_10 : i32
    %c1_i32_11 = arith.constant 1 : i32
    %21 = arith.select %20, %c1_i32_11, %c2_i32_9 : i32
    %22 = arith.remsi %19, %21 : i32
    %c0_i32_12 = arith.constant 0 : i32
    %23 = arith.cmpi ne, %22, %c0_i32_12 : i32
    %c0_i32_13 = arith.constant 0 : i32
    %24 = arith.cmpi slt, %22, %c0_i32_13 : i32
    %c0_i32_14 = arith.constant 0 : i32
    %25 = arith.cmpi slt, %21, %c0_i32_14 : i32
    %26 = arith.xori %24, %25 : i1
    %27 = arith.andi %26, %23 : i1
    %28 = arith.addi %22, %21 : i32
    %29 = arith.select %27, %28, %22 : i32
    %c256_i32_15 = arith.constant 256 : i32
    %30 = arith.muli %29, %c256_i32_15 : i32
    %c256_i32_16 = arith.constant 256 : i32
    %31 = arith.muli %arg1, %c256_i32_16 : i32
    %32 = tpu.assume_multiple %31, 256 : i32
    %33 = arith.index_cast %32 : i32 to index
    %c0 = arith.constant 0 : index
    %34 = vector.load %arg3[%33, %c0] : memref<256x256xbf16, #tpu.memory_space<vmem>>, vector<256x256xbf16>
    %c256_i32_17 = arith.constant 256 : i32
    %35 = arith.muli %arg2, %c256_i32_17 : i32
    %36 = arith.addi %18, %35 : i32
    %37 = tpu.assume_multiple %36, 256 : i32
    %38 = arith.index_cast %37 : i32 to index
    %c0_18 = arith.constant 0 : index
    %39 = vector.load %arg9[%38, %c0_18] : memref<512x128xbf16, #tpu.memory_space<vmem>>, vector<256x128xbf16>
    %c0_19 = arith.constant 0 : index
    %c0_20 = arith.constant 0 : index
    %40 = vector.load %arg10[%c0_19, %c0_20] : memref<256x128xf32, #tpu.memory_space<vmem>>, vector<256x128xf32>
    %cst = arith.constant dense<0.000000e+00> : vector<256x128xf32>
    %41 = tpu.matmul %34, %39, %cst {dimension_numbers = #tpu.dot_dimension_numbers<[1], [0], [0], [1], [0, 0, 1, 1], [], []>} : vector<256x256xbf16>, vector<256x128xbf16>, vector<256x128xf32> -> vector<256x128xf32>
    %42 = arith.addf %40, %41 : vector<256x128xf32>
    %c0_21 = arith.constant 0 : index
    %c0_22 = arith.constant 0 : index
    %43 = vector.load %arg10[%c0_21, %c0_22] : memref<256x128xf32, #tpu.memory_space<vmem>>, vector<256x128xf32>
    tpu.vector_store %arg10[%c0_21, %c0_22], %42 {strides = array<i32>} : memref<256x128xf32, #tpu.memory_space<vmem>>, vector<256x128xf32>,
    %c0_i32_23 = arith.constant 0 : i32
    %44 = arith.cmpi eq, %arg2, %c0_i32_23 : i32
    %45 = arith.extui %44 : i1 to i32
    %c0_i32_24 = arith.constant 0 : i32
    %46 = arith.cmpi ne, %45, %c0_i32_24 : i32
    scf.if %46 {
      %c256_i32_25 = arith.constant 256 : i32
      %47 = arith.muli %arg1, %c256_i32_25 : i32
      %48 = arith.addi %18, %47 : i32
      %49 = tpu.assume_multiple %48, 256 : i32
      %50 = arith.index_cast %49 : i32 to index
      %c0_26 = arith.constant 0 : index
      %51 = vector.load %arg9[%50, %c0_26] : memref<512x128xbf16, #tpu.memory_space<vmem>>, vector<256x128xbf16>
      %c0_27 = arith.constant 0 : index
      %c0_28 = arith.constant 0 : index
      %52 = vector.load %arg10[%c0_27, %c0_28] : memref<256x128xf32, #tpu.memory_space<vmem>>, vector<256x128xf32>
      %53 = arith.truncf %52 : vector<256x128xf32> to vector<256x128xbf16>
      %c0_29 = arith.constant 0 : index
      %c0_30 = arith.constant 0 : index
      %c0_31 = arith.constant 0 : index
      %54 = vector.load %arg5[%c0_29, %c0_30, %c0_31] : memref<1x128x128xbf16, #tpu.memory_space<vmem>>, vector<1x128x128xbf16>
      %55 = vector.shape_cast %54 : vector<1x128x128xbf16> to vector<128x128xbf16>
      %cst_32 = arith.constant dense<0.000000e+00> : vector<256x128xf32>
      %56 = tpu.matmul %53, %55, %cst_32 {dimension_numbers = #tpu.dot_dimension_numbers<[1], [0], [0], [1], [0, 0, 1, 1], [], []>} : vector<256x128xbf16>, vector<128x128xbf16>, vector<256x128xf32> -> vector<256x128xf32>
      %c0_33 = arith.constant 0 : index
      %c0_34 = arith.constant 0 : index
      %c0_35 = arith.constant 0 : index
      %57 = vector.load %arg6[%c0_33, %c0_34, %c0_35] : memref<1x128x128xbf16, #tpu.memory_space<vmem>>, vector<1x128x128xbf16>
      %58 = vector.shape_cast %57 : vector<1x128x128xbf16> to vector<128x128xbf16>
      %cst_36 = arith.constant dense<0.000000e+00> : vector<256x128xf32>
      %59 = tpu.matmul %51, %58, %cst_36 {dimension_numbers = #tpu.dot_dimension_numbers<[1], [0], [0], [1], [0, 0, 1, 1], [], []>} : vector<256x128xbf16>, vector<128x128xbf16>, vector<256x128xf32> -> vector<256x128xf32>
      %60 = arith.addf %56, %59 : vector<256x128xf32>
      %c0_37 = arith.constant 0 : index
      %c0_38 = arith.constant 0 : index
      %c0_39 = arith.constant 0 : index
      %61 = vector.load %arg7[%c0_37, %c0_38, %c0_39] : memref<1x1x128xf32, #tpu.memory_space<vmem>>, vector<1x1x128xf32>
      %62 = vector.shape_cast %61 : vector<1x1x128xf32> to vector<1x128xf32>
      %63 = vector.broadcast %62 : vector<1x128xf32> to vector<256x128xf32>
      %64 = arith.addf %60, %63 : vector<256x128xf32>
      %c2_i32_40 = arith.constant 2 : i32
      %65 = arith.cmpi slt, %arg0, %c2_i32_40 : i32
      %66 = arith.extui %65 : i1 to i32
      %c0_i32_41 = arith.constant 0 : i32
      %67 = arith.cmpi ne, %66, %c0_i32_41 : i32
      scf.if %67 {
        %cst_44 = arith.constant 0.000000e+00 : f32
        %71 = vector.broadcast %cst_44 : f32 to vector<256x128xf32>
        %72 = arith.maximumf %64, %71 : vector<256x128xf32>
        %73 = arith.truncf %72 : vector<256x128xf32> to vector<256x128xbf16>
        %c256_i32_45 = arith.constant 256 : i32
        %74 = arith.muli %arg1, %c256_i32_45 : i32
        %75 = arith.addi %30, %74 : i32
        %76 = tpu.assume_multiple %75, 256 : i32
        %77 = arith.index_cast %76 : i32 to index
        %c0_46 = arith.constant 0 : index
        %78 = vector.load %arg9[%77, %c0_46] : memref<512x128xbf16, #tpu.memory_space<vmem>>, vector<256x128xbf16>
        tpu.vector_store %arg9[%77, %c0_46], %73 {strides = array<i32>} : memref<512x128xbf16, #tpu.memory_space<vmem>>, vector<256x128xbf16>,
      } else {
      }
      %c2_i32_42 = arith.constant 2 : i32
      %68 = arith.cmpi eq, %arg0, %c2_i32_42 : i32
      %69 = arith.extui %68 : i1 to i32
      %c0_i32_43 = arith.constant 0 : i32
      %70 = arith.cmpi ne, %69, %c0_i32_43 : i32
      scf.if %70 {
        %c0_44 = arith.constant 0 : index
        %c0_45 = arith.constant 0 : index
        %71 = vector.load %arg8[%c0_44, %c0_45] : memref<256x128xf32, #tpu.memory_space<vmem>>, vector<256x128xf32>
        tpu.vector_store %arg8[%c0_44, %c0_45], %64 {strides = array<i32>} : memref<256x128xf32, #tpu.memory_space<vmem>>, vector<256x128xf32>,
      } else {
      }
    } else {
    }
    return
  }
  func.func @transform_0(%arg0: i32, %arg1: i32, %arg2: i32) -> (i32, i32) {
    %c0_i32 = arith.constant 0 : i32
    %c0_i32_0 = arith.constant 0 : i32
    %c0_i32_1 = arith.constant 0 : i32
    return %c0_i32, %c0_i32_0 : i32, i32
  }
  func.func @transform_1(%arg0: i32, %arg1: i32, %arg2: i32) -> (i32, i32) {
    %c0_i32 = arith.constant 0 : i32
    %0 = arith.cmpi eq, %arg0, %c0_i32 : i32
    %c0_i32_0 = arith.constant 0 : i32
    %1 = arith.cmpi eq, %arg1, %c0_i32_0 : i32
    %2 = arith.andi %0, %1 : i1
    %c0_i32_1 = arith.constant 0 : i32
    %3 = arith.select %2, %arg2, %c0_i32_1 : i32
    %c0_i32_2 = arith.constant 0 : i32
    %c0_i32_3 = arith.constant 0 : i32
    return %3, %c0_i32_2 : i32, i32
  }
  func.func @transform_2(%arg0: i32, %arg1: i32, %arg2: i32) -> (i32, i32, i32) {
    %c0_i32 = arith.constant 0 : i32
    %c0_i32_0 = arith.constant 0 : i32
    %c0_i32_1 = arith.constant 0 : i32
    return %arg0, %c0_i32, %c0_i32_0 : i32, i32, i32
  }
  func.func @transform_3(%arg0: i32, %arg1: i32, %arg2: i32) -> (i32, i32, i32) {
    %c0_i32 = arith.constant 0 : i32
    %c0_i32_0 = arith.constant 0 : i32
    %c0_i32_1 = arith.constant 0 : i32
    return %arg0, %c0_i32, %c0_i32_0 : i32, i32, i32
  }
  func.func @transform_4(%arg0: i32, %arg1: i32, %arg2: i32) -> (i32, i32, i32) {
    %c0_i32 = arith.constant 0 : i32
    %c0_i32_0 = arith.constant 0 : i32
    %c0_i32_1 = arith.constant 0 : i32
    return %arg0, %c0_i32, %c0_i32_0 : i32, i32, i32
  }
  func.func @transform_5(%arg0: i32, %arg1: i32, %arg2: i32) -> (i32, i32) {
    %c0_i32 = arith.constant 0 : i32
    %c0_i32_0 = arith.constant 0 : i32
    return %arg1, %c0_i32 : i32, i32
  }
}

</mosaic_0001>

<bundles_post_ra>
// kernel: graphsage_forward.1
= control target key start
LH: loop header
LB: loop body
LE: loop exit
PB: predicated region body
PF: predicated region fallthrough
CT: control target
= control target key end

     0   :  { %s2357_s18 = smov 0   ;;  %s2359_s19 = smov 0   ;;  %s2936_s0 = inlined_call_operand.vmem [shape: bf16[256,256], index: 0, kind: input, shape index: {}]   ;;  %s2937_s1 = inlined_call_operand.vmem [shape: bf16[256,128], index: 1, kind: input, shape index: {}]   ;;  %s2938_s2 = inlined_call_operand.vmem [shape: bf16[3,128,128], index: 2, kind: input, shape index: {}]   ;;  %s2939_s3 = inlined_call_operand.vmem [shape: bf16[3,128,128], index: 3, kind: input, shape index: {}]   ;;  %s2940_s4 = inlined_call_operand.vmem [shape: f32[3,1,128], index: 4, kind: input, shape index: {}]   ;;  %s2941_s5 = inlined_call_operand.vmem [shape: f32[256,128], index: 5, kind: output, shape index: {}]  }
   0x1   :  { %s2361_s20 = smov 0  }
   0x2 LB: > { %s34_s21 = sadd.s32 1, %s2321_s19  ;;  %p1816_p0 = scmp.ge.s32.totalorder %s2325_s20, 1  ;;  %s2325_s20 = sphi %s2361_s20, %s15_s20   ;;  %s2321_s19 = sphi %s2359_s19, %s2943_s19   ;;  %s2317_s18 = sphi %s2357_s18, %s2942_s18  }
   0x3   : > { %p36_p1 = scmp.ge.s32.totalorder %s34_s21, 3  ;;  %p255_p2 = scmp.lt.s32.totalorder %s2325_s20, 4 }
   0x5   : > { %s2945_s21 = smov (%p36_p1, %s34_s21), 0  ;;  %p256_p3 = pnand %p1816_p0, %p255_p2 }
   0x6   : > { %p317_p4 = scmp.lt.s32.totalorder (!%p256_p3), %s2317_s18, 2  ;;  %p337_p5 = scmp.eq.s32.totalorder (!%p256_p3), %s2317_s18, 0 }
   0x7   : > { %259 = sbr.rel (%p256_p3) target bundleno = 648 (0x288), region = 40 }
   0xe   : > { %s2380_s22 = scalar_select %p317_p4, %s2317_s18, 2 }
   0xf   : > { %342 = sbr.rel (!%p337_p5) target bundleno = 24 (0x18), region = 44  ;;  %v2223_v0 = vld [vmem:[%s2937_s1] sm:$0xff] (%p337_p5)   ;;  %v2224_v1 = vld [vmem:[%s2937_s1 + $0x8] sm:$0xff] (%p337_p5)   ;;  %v2225_v2 = vld [vmem:[%s2937_s1 + $0x10] sm:$0xff] (%p337_p5)  }
  0x10   : > { %s1908_s23 = sshll.u32 %s2380_s22, 6  ;;  %s329_s26 = scalar_lea.vmem %s2940_s4, %s2380_s22  ;;  %476 = vst [vmem:[#allocation2] sm:$0xff] (%p337_p5), %v2223_v0  ;;  %477 = vst [vmem:[#allocation2 + $0x8] sm:$0xff] (%p337_p5), %v2224_v1  ;;  %v2226_v3 = vld [vmem:[%s2937_s1 + $0x18] sm:$0xff] (%p337_p5)   ;;  %v2227_v4 = vld [vmem:[%s2937_s1 + $0x20] sm:$0xff] (%p337_p5)  }
  0x11   : > { %s2390_s29 = scalar_lea.vmem %s2938_s2, %s1908_s23  ;;  %s2395_s7 = scalar_lea.vmem %s2939_s3, %s1908_s23  ;;  %478 = vst [vmem:[#allocation2 + $0x10] sm:$0xff] (%p337_p5), %v2225_v2  ;;  %479 = vst [vmem:[#allocation2 + $0x18] sm:$0xff] (%p337_p5), %v2226_v3  ;;  %v2228_v5 = vld [vmem:[%s2937_s1 + $0x28] sm:$0xff] (%p337_p5)   ;;  %v2229_v6 = vld [vmem:[%s2937_s1 + $0x30] sm:$0xff] (%p337_p5)  }
  0x12   : > { %480 = vst [vmem:[#allocation2 + $0x20] sm:$0xff] (%p337_p5), %v2227_v4  ;;  %481 = vst [vmem:[#allocation2 + $0x28] sm:$0xff] (%p337_p5), %v2228_v5  ;;  %v2230_v7 = vld [vmem:[%s2937_s1 + $0x38] sm:$0xff] (%p337_p5)   ;;  %v2231_v8 = vld [vmem:[%s2937_s1 + $0x40] sm:$0xff] (%p337_p5)  }
  0x13   : > { %482 = vst [vmem:[#allocation2 + $0x30] sm:$0xff] (%p337_p5), %v2229_v6  ;;  %483 = vst [vmem:[#allocation2 + $0x38] sm:$0xff] (%p337_p5), %v2230_v7  ;;  %v2232_v9 = vld [vmem:[%s2937_s1 + $0x48] sm:$0xff] (%p337_p5)   ;;  %v2233_v10 = vld [vmem:[%s2937_s1 + $0x50] sm:$0xff] (%p337_p5)  }
  0x14   : > { %484 = vst [vmem:[#allocation2 + $0x40] sm:$0xff] (%p337_p5), %v2231_v8  ;;  %485 = vst [vmem:[#allocation2 + $0x48] sm:$0xff] (%p337_p5), %v2232_v9  ;;  %v2234_v11 = vld [vmem:[%s2937_s1 + $0x58] sm:$0xff] (%p337_p5)   ;;  %v2235_v12 = vld [vmem:[%s2937_s1 + $0x60] sm:$0xff] (%p337_p5)  }
  0x15   : > { %486 = vst [vmem:[#allocation2 + $0x50] sm:$0xff] (%p337_p5), %v2233_v10  ;;  %487 = vst [vmem:[#allocation2 + $0x58] sm:$0xff] (%p337_p5), %v2234_v11  ;;  %v2236_v13 = vld [vmem:[%s2937_s1 + $0x68] sm:$0xff] (%p337_p5)   ;;  %v2237_v14 = vld [vmem:[%s2937_s1 + $0x70] sm:$0xff] (%p337_p5)  }
  0x16   : > { %488 = vst [vmem:[#allocation2 + $0x60] sm:$0xff] %v2235_v12  ;;  %489 = vst [vmem:[#allocation2 + $0x68] sm:$0xff] %v2236_v13  ;;  %v2238_v15 = vld [vmem:[%s2937_s1 + $0x78] sm:$0xff]  }
  0x17   : > { %490 = vst [vmem:[#allocation2 + $0x70] sm:$0xff] %v2237_v14  ;;  %491 = vst [vmem:[#allocation2 + $0x78] sm:$0xff] %v2238_v15 }
  0x18 PF: > { %p528_p6 = scmp.lt.s32.totalorder %s2317_s18, 0  ;;  %s529_s30 = ssub.s32 0, %s2317_s18  ;;  %v2241_v16 = vld [vmem:[%s2936_s0 + $0x4] ss:$8 sps:$4 sm:$0xff]   ;;  %v2239_v35 = vld [vmem:[%s2936_s0] ss:$8 sps:$4 sm:$0xff]  }
  0x19   : > { %s1839_s6 = smin.u32 %s2317_s18, %s529_s30  ;;  %s541_s8 = sadd.s32 1, %s2317_s18  ;;  %839 = vmatprep.mubr.bf16.mxu0 %v2241_v16  ;;  %v2287_v32 = vld [vmem:[%s2395_s7] sm:$0xff]   ;;  %v2288_v33 = vld [vmem:[%s2395_s7 + $0x8] sm:$0xff]   ;;  %v2289_v36 = vld [vmem:[%s2395_s7 + $0x10] sm:$0xff]  }
  0x1a   : > { %s531_s11 = sand.u32 1, %s1839_s6   ;;  %s543_s13 = ssub.s32 0, %s541_s8  ;;  %2071 = vmatprep.subr.bf16.mxu1 %v2287_v32  ;;  %v2242_v37 = vld [vmem:[%s2936_s0 + $0x14] ss:$8 sps:$4 sm:$0xff]   ;;  %v2244_v39 = vld [vmem:[%s2936_s0 + $0x10] ss:$8 sps:$4 sm:$0xff]  }
  0x1b   : > { %s532_s12 = ssub.s32 0, %s531_s11  ;;  %s1843_s14 = smin.u32 %s543_s13, %s541_s8  ;;  %2072 = vmatpush3.bf16.msra.mxu1 %v2287_v32  ;;  %v2290_v38 = vld [vmem:[%s2395_s7 + $0x18] sm:$0xff]   ;;  %v2291_v40 = vld [vmem:[%s2395_s7 + $0x20] sm:$0xff]   ;;  %v2292_v42 = vld [vmem:[%s2395_s7 + $0x28] sm:$0xff]  }
  0x1c   : > { %s2947_s12 = smov (!%p528_p6, %s532_s12), %s531_s11  ;;  %p542_p8 = scmp.lt.s32.totalorder %s541_s8, 0  ;;  %2073 = vmatprep.subr.bf16.mxu1 %v2288_v33  ;;  %v2245_v41 = vld [vmem:[%s2936_s0 + $0x24] ss:$8 sps:$4 sm:$0xff]   ;;  %v2247_v43 = vld [vmem:[%s2936_s0 + $0x20] ss:$8 sps:$4 sm:$0xff]   ;;  %v2293_v44 = vld [vmem:[%s2395_s7 + $0x30] sm:$0xff]  }
  0x1d   : > { %p1841_p7 = scmp.lt.s32.totalorder %s2947_s12, 0  ;;  %s538_s15 = sadd.s32 2, %s2947_s12  ;;  %v2248_v45 = vld [vmem:[%s2936_s0 + $0x34] ss:$8 sps:$4 sm:$0xff]   ;;  %v2250_v47 = vld [vmem:[%s2936_s0 + $0x30] ss:$8 sps:$4 sm:$0xff]  }
  0x1e   : > { %s545_s16 = sand.u32 1, %s1843_s14   ;;  %v2294_v46 = vld [vmem:[%s2395_s7 + $0x38] sm:$0xff]   ;;  %v2295_v48 = vld [vmem:[%s2390_s29] sm:$0xff]   ;;  %v2296_v50 = vld [vmem:[%s2390_s29 + $0x8] sm:$0xff]   ;;  %p1898_p10 = scmp.ge.s32.totalorder %s2317_s18, 2 }
  0x1f   : > { %s2949_s15 = smov (!%p1841_p7, %s538_s15), %s2947_s12  ;;  %s546_s17 = ssub.s32 0, %s545_s16  ;;  %2074 = vmatpush3.bf16.msra.mxu1 %v2288_v33  ;;  %v2251_v49 = vld [vmem:[%s2936_s0 + $0x44] ss:$8 sps:$4 sm:$0xff]   ;;  %v2253_v51 = vld [vmem:[%s2936_s0 + $0x40] ss:$8 sps:$4 sm:$0xff]   ;;  %v2297_v52 = vld [vmem:[%s2390_s29 + $0x10] sm:$0xff]  }
  0x20   : > { %s1842_s23 = sshll.u32 %s2949_s15, 8  ;;  %s2951_s17 = smov (!%p542_p8, %s546_s17), %s545_s16  ;;  %2075 = vmatprep.subr.bf16.mxu1 %v2289_v36  ;;  %v2254_v53 = vld [vmem:[%s2936_s0 + $0x54] ss:$8 sps:$4 sm:$0xff]   ;;  %v2256_v55 = vld [vmem:[%s2936_s0 + $0x50] ss:$8 sps:$4 sm:$0xff]   ;;  %v2299_v3 = vld [vmem:[%s2390_s29 + $0x20] sm:$0xff]  }
  0x21   : > { %s595_s24 = sshra.s32 %s1842_s23, 4  ;;  %p1845_p9 = scmp.lt.s32.totalorder %s2951_s17, 0  ;;  %v2298_v54 = vld [vmem:[%s2390_s29 + $0x18] sm:$0xff]   ;;  %v2257_v56 = vld [vmem:[%s2936_s0 + $0x64] ss:$8 sps:$4 sm:$0xff]   ;;  %v2301_v7 = vld [vmem:[%s2390_s29 + $0x30] sm:$0xff]  }
  0x22   : > { %s552_s25 = sadd.s32 2, %s2951_s17  ;;  %s1847_s27 = sshll.u32 %s595_s24, 3  ;;  %v2259_v57 = vld [vmem:[%s2936_s0 + $0x60] ss:$8 sps:$4 sm:$0xff]   ;;  %v2260_v58 = vld [vmem:[%s2936_s0 + $0x74] ss:$8 sps:$4 sm:$0xff]  }
  0x23   : > { %s2953_s25 = smov (!%p1845_p9, %s552_s25), %s2951_s17  ;;  %s2455_s30 = scalar_lea.vmem [#allocation2], %s1847_s27  ;;  %2076 = vmatpush3.bf16.msra.mxu1 %v2289_v36  ;;  %v2262_v59 = vld [vmem:[%s2936_s0 + $0x70] ss:$8 sps:$4 sm:$0xff]   ;;  %v2263_v60 = vld [vmem:[%s2936_s0 + $0x84] ss:$8 sps:$4 sm:$0xff]  }
  0x24   : > { %s1846_s28 = sshll.u32 %s2953_s25, 8  ;;  %v2458_v17 = vld [vmem:[%s2455_s30 + $0x40] sm:$0xff]  ;;  %v2462_v19 = vld [vmem:[%s2455_s30 + $0x48] sm:$0xff]  ;;  %v2470_v21 = vld [vmem:[%s2455_s30 + $0x50] sm:$0xff]  ;;  %2077 = vmatprep.subr.bf16.mxu1 %v2290_v38 }
  0x25   : > { %v599_v18 = vld [vmem:[%s2455_s30] sm:$0xff]  ;;  %1911 = vmatprep.subr.bf16.mxu0 %v2458_v17  ;;  %v2467_v20 = vld [vmem:[%s2455_s30 + $0x8] sm:$0xff]  ;;  %v2475_v22 = vld [vmem:[%s2455_s30 + $0x10] sm:$0xff]  ;;  %s1646_s22 = sshra.s32 (!%p1898_p10), %s1846_s28, 4 }
  0x26   : > { %2087 = vmatprep.mubr.bf16.mxu1 %v599_v18  ;;  %1912 = vmatpush3.bf16.msra.mxu0 %v599_v18  ;;  %v2478_v23 = vld [vmem:[%s2455_s30 + $0x58] sm:$0xff]  ;;  %v2485_v25 = vld [vmem:[%s2455_s30 + $0x60] sm:$0xff]  ;;  %v2493_v27 = vld [vmem:[%s2455_s30 + $0x68] sm:$0xff] }
  0x27   : > { %1913 = vmatprep.subr.bf16.mxu0 %v2462_v19  ;;  %v2481_v24 = vld [vmem:[%s2455_s30 + $0x18] sm:$0xff]  ;;  %v2489_v26 = vld [vmem:[%s2455_s30 + $0x20] sm:$0xff]  ;;  %v2497_v28 = vld [vmem:[%s2455_s30 + $0x28] sm:$0xff]  ;;  %2078 = vmatpush3.bf16.msra.mxu1 %v2290_v38 }
  0x28   : > { %v2501_v29 = vld [vmem:[%s2455_s30 + $0x70] sm:$0xff]  ;;  %v2510_v31 = vld [vmem:[%s2455_s30 + $0x78] sm:$0xff]  ;;  %2079 = vmatprep.subr.bf16.mxu1 %v2291_v40  ;;  %v2265_v61 = vld [vmem:[%s2936_s0 + $0x80] ss:$8 sps:$4 sm:$0xff]  }
  0x29   : > { %v2507_v30 = vld [vmem:[%s2455_s30 + $0x30] sm:$0xff]  ;;  %v2517_v34 = vld [vmem:[%s2455_s30 + $0x38] sm:$0xff]  ;;  %v2269_v0 = vld [vmem:[%s2936_s0 + $0xa4] ss:$8 sps:$4 sm:$0xff]  }
  0x2a   : > { %1914 = vmatpush3.bf16.msra.mxu0 %v2467_v20  ;;  %v2266_v62 = vld [vmem:[%s2936_s0 + $0x94] ss:$8 sps:$4 sm:$0xff]   ;;  %v2268_v63 = vld [vmem:[%s2936_s0 + $0x90] ss:$8 sps:$4 sm:$0xff]   ;;  %v2271_v1 = vld [vmem:[%s2936_s0 + $0xa0] ss:$8 sps:$4 sm:$0xff]  }
  0x2b   : > { %1915 = vmatprep.subr.bf16.mxu0 %v2470_v21  ;;  %2080 = vmatpush3.bf16.msra.mxu1 %v2291_v40  ;;  %v2272_v2 = vld [vmem:[%s2936_s0 + $0xb4] ss:$8 sps:$4 sm:$0xff]   ;;  %v2274_v4 = vld [vmem:[%s2936_s0 + $0xb0] ss:$8 sps:$4 sm:$0xff]   ;;  %v2275_v5 = vld [vmem:[%s2936_s0 + $0xc4] ss:$8 sps:$4 sm:$0xff]  }
  0x2c   : > { %2081 = vmatprep.subr.bf16.mxu1 %v2292_v42  ;;  %v2300_v6 = vld [vmem:[%s2390_s29 + $0x28] sm:$0xff]   ;;  %v2278_v9 = vld [vmem:[%s2936_s0 + $0xd4] ss:$8 sps:$4 sm:$0xff]   ;;  %v2280_v11 = vld [vmem:[%s2936_s0 + $0xd0] ss:$8 sps:$4 sm:$0xff]  }
  0x2d   : > { %v2277_v8 = vld [vmem:[%s2936_s0 + $0xc0] ss:$8 sps:$4 sm:$0xff]   ;;  %v2302_v10 = vld [vmem:[%s2390_s29 + $0x38] sm:$0xff]   ;;  %v2281_v12 = vld [vmem:[%s2936_s0 + $0xe4] ss:$8 sps:$4 sm:$0xff]  }
  0x2e   : > { %1916 = vmatpush3.bf16.msra.mxu0 %v2475_v22  ;;  %v2283_v13 = vld [vmem:[%s2936_s0 + $0xe0] ss:$8 sps:$4 sm:$0xff]   ;;  %v2284_v14 = vld [vmem:[%s2936_s0 + $0xf4] ss:$8 sps:$4 sm:$0xff]   ;;  %v2286_v15 = vld [vmem:[%s2936_s0 + $0xf0] ss:$8 sps:$4 sm:$0xff]  }
  0x2f   : > { %1917 = vmatprep.subr.bf16.mxu0 %v2478_v23  ;;  %2082 = vmatpush3.bf16.msra.mxu1 %v2292_v42 }
  0x30   : > { %2083 = vmatprep.subr.bf16.mxu1 %v2293_v44 }
  0x32   : > { %1918 = vmatpush3.bf16.msra.mxu0 %v2481_v24 }
  0x33   : > { %1919 = vmatprep.subr.bf16.mxu0 %v2485_v25  ;;  %2084 = vmatpush3.bf16.msra.mxu1 %v2293_v44 }
  0x34   : > { %2085 = vmatprep.subr.bf16.mxu1 %v2294_v46 }
  0x36   : > { %1920 = vmatpush3.bf16.msra.mxu0 %v2489_v26 }
  0x37   : > { %1921 = vmatprep.subr.bf16.mxu0 %v2493_v27  ;;  %2086 = vmatpush3.bf16.msra.mxu1 %v2294_v46 }
  0x38   : > { %2119 = vmatprep.subr.bf16.mxu1 %v2295_v48 }
  0x3a   : > { %1922 = vmatpush3.bf16.msra.mxu0 %v2497_v28  ;;  %2088 = vmatmul.mubr.bf16.vlgmr.msra.gmra.mrb[0].mxu1 %v2467_v20 }
  0x3b   : > { %1923 = vmatprep.subr.bf16.mxu0 %v2501_v29  ;;  %2091 = vmatprep.mubr.bf16.mxu1 %v2475_v22 }
  0x3c   : > { %2120 = vmatpush3.bf16.msra.mxu1 %v2295_v48 }
  0x3d   : > { %2121 = vmatprep.subr.bf16.mxu1 %v2296_v50 }
  0x3e   : > { %1924 = vmatpush3.bf16.msra.mxu0 %v2507_v30 }
  0x3f   : > { %1925 = vmatprep.subr.bf16.mxu0 %v2510_v31 }
  0x40   : > { %2122 = vmatpush3.bf16.msra.mxu1 %v2296_v50 }
  0x41   : > { %2123 = vmatprep.subr.bf16.mxu1 %v2297_v52 }
  0x42   : > { %1926 = vmatpush3.bf16.msra.mxu0 %v2517_v34  ;;  %2092 = vmatmul.mubr.bf16.gmra.mrb[4].mxu1 %v2481_v24 }
  0x43   : > { %2095 = vmatprep.mubr.bf16.mxu1 %v2489_v26 }
  0x44   : > { %2124 = vmatpush3.bf16.msra.mxu1 %v2297_v52 }
  0x45   : > { %840 = vmatmul.mubr.bf16.vlgmr.msra.gmra.mrb[0].mxu0 %v2239_v35  ;;  %2125 = vmatprep.subr.bf16.mxu1 %v2298_v54 }
  0x46   : > { %847 = vmatprep.mubr.bf16.mxu0 %v2242_v37 }
  0x48   : > { %2126 = vmatpush3.bf16.msra.mxu1 %v2298_v54 }
  0x49   : > { %2127 = vmatprep.subr.bf16.mxu1 %v2299_v3 }
  0x4a   : > { %2096 = vmatmul.mubr.bf16.gmra.mrb[8].mxu1 %v2497_v28 }
  0x4b   : > { %2099 = vmatprep.mubr.bf16.mxu1 %v2507_v30 }
  0x4c   : > { %2128 = vmatpush3.bf16.msra.mxu1 %v2299_v3 }
  0x4d   : > { %848 = vmatmul.mubr.bf16.gmra.mrb[4].mxu0 %v2244_v39  ;;  %2129 = vmatprep.subr.bf16.mxu1 %v2300_v6 }
  0x4e   : > { %855 = vmatprep.mubr.bf16.mxu0 %v2245_v41 }
  0x50   : > { %2130 = vmatpush3.bf16.msra.mxu1 %v2300_v6 }
  0x51   : > { %2131 = vmatprep.subr.bf16.mxu1 %v2301_v7 }
  0x52   : > { %2100 = vmatmul.mubr.bf16.gmra.mrb[12].mxu1 %v2517_v34 }
  0x53   : > { %2103 = vmatprep.mubr.bf16.mxu1 %v2458_v17 }
  0x54   : > { %2132 = vmatpush3.bf16.msra.mxu1 %v2301_v7 }
  0x55   : > { %856 = vmatmul.mubr.bf16.gmra.mrb[8].mxu0 %v2247_v43  ;;  %2133 = vmatprep.subr.bf16.mxu1 %v2302_v10 }
  0x56   : > { %863 = vmatprep.mubr.bf16.mxu0 %v2248_v45 }
  0x58   : > { %2134 = vmatpush3.bf16.msra.mxu1 %v2302_v10 }
  0x5a   : > { %2104 = vmatmul.mubr.bf16.gmra.mrb[16].mxu1 %v2462_v19 }
  0x5b   : > { %2107 = vmatprep.mubr.bf16.mxu1 %v2470_v21 }
  0x5d   : > { %864 = vmatmul.mubr.bf16.gmra.mrb[12].mxu0 %v2250_v47 }
  0x5e   : > { %871 = vmatprep.mubr.bf16.mxu0 %v2251_v49 }
  0x62   : > { %2108 = vmatmul.mubr.bf16.gmra.mrb[20].mxu1 %v2478_v23 }
  0x63   : > { %2111 = vmatprep.mubr.bf16.mxu1 %v2485_v25 }
  0x65   : > { %872 = vmatmul.mubr.bf16.gmra.mrb[16].mxu0 %v2253_v51 }
  0x66   : > { %879 = vmatprep.mubr.bf16.mxu0 %v2254_v53 }
  0x6a   : > { %2112 = vmatmul.mubr.bf16.gmra.mrb[24].mxu1 %v2493_v27 }
  0x6b   : > { %2115 = vmatprep.mubr.bf16.mxu1 %v2501_v29 }
  0x6d   : > { %880 = vmatmul.mubr.bf16.gmra.mrb[20].mxu0 %v2256_v55 }
  0x6e   : > { %887 = vmatprep.mubr.bf16.mxu0 %v2257_v56 }
  0x72   : > { %2116 = vmatmul.mubr.bf16.gmra.mrb[28].mxu1 %v2510_v31 }
  0x75   : > { %888 = vmatmul.mubr.bf16.gmra.mrb[24].mxu0 %v2259_v57 }
  0x76   : > { %895 = vmatprep.mubr.bf16.mxu0 %v2260_v58 }
  0x7d   : > { %896 = vmatmul.mubr.bf16.gmra.mrb[28].mxu0 %v2262_v59 }
  0x7e   : > { %903 = vmatprep.mubr.bf16.mxu0 %v2263_v60 }
  0x85   : > { %904 = vmatmul.mubr.bf16.gmra.mrb[32].mxu0 %v2265_v61 }
  0x86   : > { %911 = vmatprep.mubr.bf16.mxu0 %v2266_v62 }
  0x8d   : > { %912 = vmatmul.mubr.bf16.gmra.mrb[36].mxu0 %v2268_v63 }
  0x8e   : > { %919 = vmatprep.mubr.bf16.mxu0 %v2269_v0 }
  0x95   : > { %920 = vmatmul.mubr.bf16.gmra.mrb[40].mxu0 %v2271_v1 }
  0x96   : > { %927 = vmatprep.mubr.bf16.mxu0 %v2272_v2 }
  0x9d   : > { %928 = vmatmul.mubr.bf16.gmra.mrb[44].mxu0 %v2274_v4 }
  0x9e   : > { %935 = vmatprep.mubr.bf16.mxu0 %v2275_v5 }
  0xa5   : > { %936 = vmatmul.mubr.bf16.gmra.mrb[48].mxu0 %v2277_v8 }
  0xa6   : > { %943 = vmatprep.mubr.bf16.mxu0 %v2278_v9 }
  0xad   : > { %944 = vmatmul.mubr.bf16.gmra.mrb[52].mxu0 %v2280_v11 }
  0xae   : > { %951 = vmatprep.mubr.bf16.mxu0 %v2281_v12 }
  0xb5   : > { %952 = vmatmul.mubr.bf16.gmra.mrb[56].mxu0 %v2283_v13 }
  0xb6   : > { %959 = vmatprep.mubr.bf16.mxu0 %v2284_v14 }
  0xbd   : > { %960 = vmatmul.mubr.bf16.gmra.mrb[60].mxu0 %v2286_v15 }
 0x118   : > { %v1927_v16 = vpop.f32.mrb[0].mxu0 }
 0x119   : > { %v1928_v17 = vpop.f32.mrb[1].mxu0 }
 0x11a   : > { %v1929_v18 = vadd.f32 %v1928_v17, %v1927_v16  ;;  %v1930_v19 = vpop.f32.mrb[2].mxu0 }
 0x11b   : > { %v1931_v20 = vpop.f32.mrb[3].mxu0 }
 0x11c   : > { %v1932_v21 = vadd.f32 %v1931_v20, %v1930_v19 }
 0x11e   : > { %v1088_v22 = vpack.c.bf16 %v1932_v21, %v1929_v18 }
 0x120   : > { %v1933_v23 = vpop.f32.mrb[4].mxu0  ;;  %2135 = vmatprep.mubr.bf16.mxu1 %v1088_v22 }
 0x121   : > { %v1934_v24 = vpop.f32.mrb[5].mxu0 }
 0x122   : > { %v1935_v25 = vadd.f32 %v1934_v24, %v1933_v23  ;;  %v1936_v26 = vpop.f32.mrb[6].mxu0 }
 0x123   : > { %v1937_v27 = vpop.f32.mrb[7].mxu0 }
 0x124   : > { %v1938_v28 = vadd.f32 %v1937_v27, %v1936_v26 }
 0x126   : > { %v1089_v29 = vpack.c.bf16 %v1938_v28, %v1935_v25 }
 0x128   : > { %v1939_v30 = vpop.f32.mrb[8].mxu0  ;;  %2136 = vmatmul.mubr.bf16.vlgmr.msra.gmra.mrb[0].mxu1 %v1089_v29 }
 0x129   : > { %v1940_v31 = vpop.f32.mrb[9].mxu0 }
 0x12a   : > { %v1941_v32 = vadd.f32 %v1940_v31, %v1939_v30  ;;  %v1942_v33 = vpop.f32.mrb[10].mxu0 }
 0x12b   : > { %v1943_v34 = vpop.f32.mrb[11].mxu0 }
 0x12c   : > { %v1944_v35 = vadd.f32 %v1943_v34, %v1942_v33 }
 0x12e   : > { %v1090_v36 = vpack.c.bf16 %v1944_v35, %v1941_v32 }
 0x130   : > { %v1945_v37 = vpop.f32.mrb[12].mxu0  ;;  %2139 = vmatprep.mubr.bf16.mxu1 %v1090_v36 }
 0x131   : > { %v1946_v38 = vpop.f32.mrb[13].mxu0 }
 0x132   : > { %v1947_v39 = vadd.f32 %v1946_v38, %v1945_v37  ;;  %v1948_v40 = vpop.f32.mrb[14].mxu0 }
 0x133   : > { %v1949_v41 = vpop.f32.mrb[15].mxu0 }
 0x134   : > { %v1950_v42 = vadd.f32 %v1949_v41, %v1948_v40 }
 0x136   : > { %v1091_v43 = vpack.c.bf16 %v1950_v42, %v1947_v39 }
 0x138   : > { %v1951_v44 = vpop.f32.mrb[16].mxu0  ;;  %2140 = vmatmul.mubr.bf16.gmra.mrb[4].mxu1 %v1091_v43 }
 0x139   : > { %v1952_v45 = vpop.f32.mrb[17].mxu0 }
 0x13a   : > { %v1953_v46 = vadd.f32 %v1952_v45, %v1951_v44  ;;  %v1954_v47 = vpop.f32.mrb[18].mxu0 }
 0x13b   : > { %v1955_v48 = vpop.f32.mrb[19].mxu0 }
 0x13c   : > { %v1956_v49 = vadd.f32 %v1955_v48, %v1954_v47 }
 0x13e   : > { %v1092_v50 = vpack.c.bf16 %v1956_v49, %v1953_v46 }
 0x140   : > { %v1957_v51 = vpop.f32.mrb[20].mxu0  ;;  %2143 = vmatprep.mubr.bf16.mxu1 %v1092_v50 }
 0x141   : > { %v1958_v52 = vpop.f32.mrb[21].mxu0 }
 0x142   : > { %v1959_v53 = vadd.f32 %v1958_v52, %v1957_v51  ;;  %v1960_v54 = vpop.f32.mrb[22].mxu0 }
 0x143   : > { %v1961_v55 = vpop.f32.mrb[23].mxu0 }
 0x144   : > { %v1962_v56 = vadd.f32 %v1961_v55, %v1960_v54 }
 0x146   : > { %v1093_v57 = vpack.c.bf16 %v1962_v56, %v1959_v53 }
 0x148   : > { %v1963_v58 = vpop.f32.mrb[24].mxu0  ;;  %2144 = vmatmul.mubr.bf16.gmra.mrb[8].mxu1 %v1093_v57 }
 0x149   : > { %v1964_v59 = vpop.f32.mrb[25].mxu0 }
 0x14a   : > { %v1965_v60 = vadd.f32 %v1964_v59, %v1963_v58  ;;  %v1966_v61 = vpop.f32.mrb[26].mxu0 }
 0x14b   : > { %v1967_v62 = vpop.f32.mrb[27].mxu0 }
 0x14c   : > { %v1968_v63 = vadd.f32 %v1967_v62, %v1966_v61 }
 0x14e   : > { %v1094_v0 = vpack.c.bf16 %v1968_v63, %v1965_v60 }
 0x150   : > { %v1969_v1 = vpop.f32.mrb[28].mxu0  ;;  %2147 = vmatprep.mubr.bf16.mxu1 %v1094_v0  ;;  %v2647_v0 = vld [vmem:[%s329_s26] ss:$0 sm:$0xff]  ;;  %s1899_s26 = sshll.u32 (!%p1898_p10), %s1646_s22, 3 }
 0x151   : > { %v1970_v2 = vpop.f32.mrb[29].mxu0  ;;  %s2760_s25 = scalar_lea.vmem (!%p1898_p10), [#allocation2], %s1899_s26 }
 0x152   : > { %v1971_v3 = vadd.f32 %v1970_v2, %v1969_v1  ;;  %v1972_v4 = vpop.f32.mrb[30].mxu0 }
 0x153   : > { %v1973_v5 = vpop.f32.mrb[31].mxu0 }
 0x154   : > { %v1974_v6 = vadd.f32 %v1973_v5, %v1972_v4 }
 0x156   : > { %v1095_v7 = vpack.c.bf16 %v1974_v6, %v1971_v3 }
 0x158   : > { %v1975_v8 = vpop.f32.mrb[32].mxu0  ;;  %2148 = vmatmul.mubr.bf16.gmra.mrb[12].mxu1 %v1095_v7 }
 0x159   : > { %v1976_v9 = vpop.f32.mrb[33].mxu0 }
 0x15a   : > { %v1977_v10 = vadd.f32 %v1976_v9, %v1975_v8  ;;  %v1978_v11 = vpop.f32.mrb[34].mxu0 }
 0x15b   : > { %v1979_v12 = vpop.f32.mrb[35].mxu0 }
 0x15c   : > { %v1980_v13 = vadd.f32 %v1979_v12, %v1978_v11 }
 0x15e   : > { %v1096_v14 = vpack.c.bf16 %v1980_v13, %v1977_v10 }
 0x160   : > { %v1981_v15 = vpop.f32.mrb[36].mxu0  ;;  %2151 = vmatprep.mubr.bf16.mxu1 %v1096_v14 }
 0x161   : > { %v1982_v16 = vpop.f32.mrb[37].mxu0 }
 0x162   : > { %v1983_v17 = vadd.f32 %v1982_v16, %v1981_v15  ;;  %v1984_v18 = vpop.f32.mrb[38].mxu0 }
 0x163   : > { %v1985_v19 = vpop.f32.mrb[39].mxu0 }
 0x164   : > { %v1986_v20 = vadd.f32 %v1985_v19, %v1984_v18 }
 0x166   : > { %v1097_v21 = vpack.c.bf16 %v1986_v20, %v1983_v17 }
 0x168   : > { %v1987_v22 = vpop.f32.mrb[40].mxu0  ;;  %2152 = vmatmul.mubr.bf16.gmra.mrb[16].mxu1 %v1097_v21 }
 0x169   : > { %v1988_v23 = vpop.f32.mrb[41].mxu0 }
 0x16a   : > { %v1989_v24 = vadd.f32 %v1988_v23, %v1987_v22  ;;  %v1990_v25 = vpop.f32.mrb[42].mxu0 }
 0x16b   : > { %v1991_v26 = vpop.f32.mrb[43].mxu0 }
 0x16c   : > { %v1992_v27 = vadd.f32 %v1991_v26, %v1990_v25 }
 0x16e   : > { %v1098_v28 = vpack.c.bf16 %v1992_v27, %v1989_v24 }
 0x170   : > { %v1993_v29 = vpop.f32.mrb[44].mxu0  ;;  %2155 = vmatprep.mubr.bf16.mxu1 %v1098_v28 }
 0x171   : > { %v1994_v30 = vpop.f32.mrb[45].mxu0 }
 0x172   : > { %v1995_v31 = vadd.f32 %v1994_v30, %v1993_v29  ;;  %v1996_v32 = vpop.f32.mrb[46].mxu0 }
 0x173   : > { %v1997_v33 = vpop.f32.mrb[47].mxu0 }
 0x174   : > { %v1998_v34 = vadd.f32 %v1997_v33, %v1996_v32 }
 0x176   : > { %v1099_v35 = vpack.c.bf16 %v1998_v34, %v1995_v31 }
 0x178   : > { %v1999_v36 = vpop.f32.mrb[48].mxu0  ;;  %2156 = vmatmul.mubr.bf16.gmra.mrb[20].mxu1 %v1099_v35 }
 0x179   : > { %v2000_v37 = vpop.f32.mrb[49].mxu0 }
 0x17a   : > { %v2001_v38 = vadd.f32 %v2000_v37, %v1999_v36  ;;  %v2002_v39 = vpop.f32.mrb[50].mxu0 }
 0x17b   : > { %v2003_v40 = vpop.f32.mrb[51].mxu0 }
 0x17c   : > { %v2004_v41 = vadd.f32 %v2003_v40, %v2002_v39 }
 0x17e   : > { %v1100_v42 = vpack.c.bf16 %v2004_v41, %v2001_v38 }
 0x180   : > { %v2005_v43 = vpop.f32.mrb[52].mxu0  ;;  %2159 = vmatprep.mubr.bf16.mxu1 %v1100_v42 }
 0x181   : > { %v2006_v44 = vpop.f32.mrb[53].mxu0 }
 0x182   : > { %v2007_v45 = vadd.f32 %v2006_v44, %v2005_v43  ;;  %v2008_v46 = vpop.f32.mrb[54].mxu0 }
 0x183   : > { %v2009_v47 = vpop.f32.mrb[55].mxu0 }
 0x184   : > { %v2010_v48 = vadd.f32 %v2009_v47, %v2008_v46 }
 0x186   : > { %v1101_v49 = vpack.c.bf16 %v2010_v48, %v2007_v45 }
 0x188   : > { %v2011_v50 = vpop.f32.mrb[56].mxu0  ;;  %2160 = vmatmul.mubr.bf16.gmra.mrb[24].mxu1 %v1101_v49 }
 0x189   : > { %v2012_v51 = vpop.f32.mrb[57].mxu0 }
 0x18a   : > { %v2013_v52 = vadd.f32 %v2012_v51, %v2011_v50  ;;  %v2014_v53 = vpop.f32.mrb[58].mxu0 }
 0x18b   : > { %v2015_v54 = vpop.f32.mrb[59].mxu0 }
 0x18c   : > { %v2016_v55 = vadd.f32 %v2015_v54, %v2014_v53 }
 0x18e   : > { %v1102_v56 = vpack.c.bf16 %v2016_v55, %v2013_v52 }
 0x190   : > { %v2017_v57 = vpop.f32.mrb[60].mxu0  ;;  %2163 = vmatprep.mubr.bf16.mxu1 %v1102_v56 }
 0x191   : > { %v2018_v58 = vpop.f32.mrb[61].mxu0 }
 0x192   : > { %v2019_v59 = vadd.f32 %v2018_v58, %v2017_v57  ;;  %v2020_v60 = vpop.f32.mrb[62].mxu0 }
 0x193   : > { %v2021_v61 = vpop.f32.mrb[63].mxu0 }
 0x194   : > { %v2022_v62 = vadd.f32 %v2021_v61, %v2020_v60 }
 0x196   : > { %v1103_v63 = vpack.c.bf16 %v2022_v62, %v2019_v59 }
 0x198   : > { %2164 = vmatmul.mubr.bf16.gmra.mrb[28].mxu1 %v1103_v63 }
 0x1fb   : > { %v2137_v1 = vpop.f32.mrb[0].mxu1 }
 0x1fc   : > { %v2650_v2 = vadd.f32 %v2137_v1, %v2647_v0  ;;  %v1427_v3 = vpop.f32.mrb[1].mxu1 }
 0x1fd   : > { %v2653_v4 = vadd.f32 %v2647_v0, %v1427_v3  ;;  %v2138_v5 = vpop.f32.mrb[2].mxu1 }
 0x1fe   : > { %v2656_v6 = vadd.f32 %v2138_v5, %v2647_v0  ;;  %v1430_v7 = vpop.f32.mrb[3].mxu1 }
 0x1ff   : > { %v2659_v8 = vadd.f32 %v2647_v0, %v1430_v7  ;;  %v1597_v3 = vmax.f32 (!%p1898_p10), %v2653_v4, 0.0  ;;  %v1599_v7 = vmax.f32 (!%p1898_p10), %v2650_v2, 0.0 }
 0x201   : > { %v1598_v5 = vmax.f32 (!%p1898_p10), %v2659_v8, 0.0 }
 0x20b   : > { %v2141_v9 = vpop.f32.mrb[4].mxu1 }
 0x20c   : > { %v2662_v10 = vadd.f32 %v2141_v9, %v2647_v0  ;;  %v1443_v11 = vpop.f32.mrb[5].mxu1  ;;  %v1600_v9 = vmax.f32 (!%p1898_p10), %v2656_v6, 0.0 }
 0x20d   : > { %v2665_v12 = vadd.f32 %v2647_v0, %v1443_v11  ;;  %v2142_v13 = vpop.f32.mrb[6].mxu1 }
 0x20e   : > { %v2668_v14 = vadd.f32 %v2142_v13, %v2647_v0  ;;  %v1446_v15 = vpop.f32.mrb[7].mxu1  ;;  %v1603_v13 = vmax.f32 (!%p1898_p10), %v2662_v10, 0.0 }
 0x20f   : > { %v2671_v16 = vadd.f32 %v2647_v0, %v1446_v15  ;;  %v1601_v11 = vmax.f32 (!%p1898_p10), %v2665_v12, 0.0 }
 0x210   : > { %v1604_v15 = vmax.f32 (!%p1898_p10), %v2668_v14, 0.0 }
 0x21b   : > { %v2145_v17 = vpop.f32.mrb[8].mxu1 }
 0x21c   : > { %v2674_v18 = vadd.f32 %v2145_v17, %v2647_v0  ;;  %v1459_v19 = vpop.f32.mrb[9].mxu1  ;;  %v1629_v17 = vpack.c.bf16 (!%p1898_p10), %v1598_v5, %v1597_v3 }
 0x21d   : > { %v2677_v20 = vadd.f32 %v2647_v0, %v1459_v19  ;;  %v2146_v21 = vpop.f32.mrb[10].mxu1  ;;  %v1630_v19 = vpack.c.bf16 (!%p1898_p10), %v1600_v9, %v1599_v7 }
 0x21e   : > { %v2680_v22 = vadd.f32 %v2146_v21, %v2647_v0  ;;  %v1462_v23 = vpop.f32.mrb[11].mxu1  ;;  %1650 = vst [vmem:[%s2760_s25] sm:$0xff] (!%p1898_p10), %v1629_v17 }
 0x21f   : > { %v2683_v24 = vadd.f32 %v2647_v0, %v1462_v23  ;;  %v1605_v21 = vmax.f32 (!%p1898_p10), %v2677_v20, 0.0  ;;  %1651 = vst [vmem:[%s2760_s25 + $0x8] sm:$0xff] (!%p1898_p10), %v1630_v19 }
 0x221   : > { %v1606_v23 = vmax.f32 (!%p1898_p10), %v2683_v24, 0.0 }
 0x22b   : > { %v2149_v25 = vpop.f32.mrb[12].mxu1 }
 0x22c   : > { %v2686_v26 = vadd.f32 %v2149_v25, %v2647_v0  ;;  %v1475_v27 = vpop.f32.mrb[13].mxu1 }
 0x22d   : > { %v2689_v28 = vadd.f32 %v2647_v0, %v1475_v27  ;;  %v2150_v29 = vpop.f32.mrb[14].mxu1  ;;  %v1632_v27 = vpack.c.bf16 (!%p1898_p10), %v1604_v15, %v1603_v13 }
 0x22e   : > { %v2692_v30 = vadd.f32 %v2150_v29, %v2647_v0  ;;  %v1478_v31 = vpop.f32.mrb[15].mxu1  ;;  %v1607_v29 = vmax.f32 (!%p1898_p10), %v2674_v18, 0.0 }
 0x22f   : > { %v2695_v32 = vadd.f32 %v2647_v0, %v1478_v31  ;;  %v1608_v31 = vmax.f32 (!%p1898_p10), %v2680_v22, 0.0  ;;  %1653 = vst [vmem:[%s2760_s25 + $0x18] sm:$0xff] (!%p1898_p10), %v1632_v27 }
 0x23b   : > { %v2153_v33 = vpop.f32.mrb[16].mxu1 }
 0x23c   : > { %v2698_v34 = vadd.f32 %v2153_v33, %v2647_v0  ;;  %v1491_v35 = vpop.f32.mrb[17].mxu1  ;;  %v1633_v33 = vpack.c.bf16 (!%p1898_p10), %v1606_v23, %v1605_v21 }
 0x23d   : > { %v2701_v36 = vadd.f32 %v2647_v0, %v1491_v35  ;;  %v2154_v37 = vpop.f32.mrb[18].mxu1  ;;  %v1609_v35 = vmax.f32 (!%p1898_p10), %v2689_v28, 0.0 }
 0x23e   : > { %v2704_v38 = vadd.f32 %v2154_v37, %v2647_v0  ;;  %v1494_v39 = vpop.f32.mrb[19].mxu1  ;;  %v1610_v37 = vmax.f32 (!%p1898_p10), %v2695_v32, 0.0  ;;  %1654 = vst [vmem:[%s2760_s25 + $0x20] sm:$0xff] (!%p1898_p10), %v1633_v33 }
 0x23f   : > { %v2707_v40 = vadd.f32 %v2647_v0, %v1494_v39  ;;  %v1611_v39 = vmax.f32 (!%p1898_p10), %v2686_v26, 0.0 }
 0x24b   : > { %v2157_v41 = vpop.f32.mrb[20].mxu1 }
 0x24c   : > { %v2710_v42 = vadd.f32 %v2157_v41, %v2647_v0  ;;  %v1507_v43 = vpop.f32.mrb[21].mxu1  ;;  %v1634_v41 = vpack.c.bf16 (!%p1898_p10), %v1608_v31, %v1607_v29 }
 0x24d   : > { %v2713_v44 = vadd.f32 %v2647_v0, %v1507_v43  ;;  %v2158_v45 = vpop.f32.mrb[22].mxu1  ;;  %v1612_v43 = vmax.f32 (!%p1898_p10), %v2692_v30, 0.0 }
 0x24e   : > { %v2716_v46 = vadd.f32 %v2158_v45, %v2647_v0  ;;  %v1510_v47 = vpop.f32.mrb[23].mxu1  ;;  %v1613_v45 = vmax.f32 (!%p1898_p10), %v2701_v36, 0.0  ;;  %1655 = vst [vmem:[%s2760_s25 + $0x28] sm:$0xff] (!%p1898_p10), %v1634_v41 }
 0x24f   : > { %v2719_v48 = vadd.f32 %v2647_v0, %v1510_v47  ;;  %v1614_v47 = vmax.f32 (!%p1898_p10), %v2707_v40, 0.0 }
 0x250   : > { %v1620_v5 = vmax.f32 (!%p1898_p10), %v2716_v46, 0.0 }
 0x25b   : > { %v2161_v49 = vpop.f32.mrb[24].mxu1 }
 0x25c   : > { %v2722_v50 = vadd.f32 %v2161_v49, %v2647_v0  ;;  %v1523_v51 = vpop.f32.mrb[25].mxu1  ;;  %v1635_v49 = vpack.c.bf16 (!%p1898_p10), %v1610_v37, %v1609_v35 }
 0x25d   : > { %v2725_v52 = vadd.f32 %v2647_v0, %v1523_v51  ;;  %v2162_v53 = vpop.f32.mrb[26].mxu1  ;;  %v1615_v51 = vmax.f32 (!%p1898_p10), %v2698_v34, 0.0 }
 0x25e   : > { %v2728_v54 = vadd.f32 %v2162_v53, %v2647_v0  ;;  %v1526_v55 = vpop.f32.mrb[27].mxu1  ;;  %v1616_v53 = vmax.f32 (!%p1898_p10), %v2704_v38, 0.0  ;;  %1656 = vst [vmem:[%s2760_s25 + $0x30] sm:$0xff] (!%p1898_p10), %v1635_v49 }
 0x25f   : > { %v2731_v56 = vadd.f32 %v2647_v0, %v1526_v55  ;;  %v1617_v55 = vmax.f32 (!%p1898_p10), %v2713_v44, 0.0  ;;  %v1621_v7 = vmax.f32 (!%p1898_p10), %v2725_v52, 0.0 }
 0x260   : > { %v1638_v3 = vpack.c.bf16 (!%p1898_p10), %v1616_v53, %v1615_v51  ;;  %v1624_v13 = vmax.f32 (!%p1898_p10), %v2728_v54, 0.0 }
 0x261   : > { %v1622_v9 = vmax.f32 (!%p1898_p10), %v2731_v56, 0.0 }
 0x262   : > { %1659 = vst [vmem:[%s2760_s25 + $0x48] sm:$0xff] (!%p1898_p10), %v1638_v3 }
 0x263   : > { %v1641_v19 = vpack.c.bf16 (!%p1898_p10), %v1622_v9, %v1621_v7 }
 0x265   : > { %1662 = vst [vmem:[%s2760_s25 + $0x60] sm:$0xff] (!%p1898_p10), %v1641_v19 }
 0x269   : > { %1596 = sbr.rel (%p1898_p10) target bundleno = 631 (0x277), region = 56 }
 0x26b   : > { %v2165_v57 = vpop.f32.mrb[28].mxu1 }
 0x26c   : > { %v2734_v58 = vadd.f32 %v2165_v57, %v2647_v0  ;;  %v1539_v59 = vpop.f32.mrb[29].mxu1  ;;  %v1636_v57 = vpack.c.bf16 (!%p1898_p10), %v1612_v43, %v1611_v39 }
 0x26d   : > { %v2737_v60 = vadd.f32 %v2647_v0, %v1539_v59  ;;  %v2166_v61 = vpop.f32.mrb[30].mxu1  ;;  %v1637_v59 = vpack.c.bf16 (!%p1898_p10), %v1614_v47, %v1613_v45 }
 0x26e   : > { %v2740_v62 = vadd.f32 %v2166_v61, %v2647_v0  ;;  %v1542_v63 = vpop.f32.mrb[31].mxu1  ;;  %v1618_v61 = vmax.f32 (!%p1898_p10), %v2719_v48, 0.0  ;;  %1657 = vst [vmem:[%s2760_s25 + $0x38] sm:$0xff] (!%p1898_p10), %v1636_v57  ;;  %v1627_v23 = vmax.f32 (!%p1898_p10), %v2734_v58, 0.0 }
 0x26f   : > { %v2743_v1 = vadd.f32 %v2647_v0, %v1542_v63  ;;  %v1602_v0 = vmax.f32 (!%p1898_p10), %v2671_v16, 0.0  ;;  %v1619_v63 = vmax.f32 (!%p1898_p10), %v2710_v42, 0.0  ;;  %1658 = vst [vmem:[%s2760_s25 + $0x40] sm:$0xff] (!%p1898_p10), %v1637_v59  ;;  %v1625_v15 = vmax.f32 (!%p1898_p10), %v2737_v60, 0.0 }
 0x270   : > { %v1628_v27 = vmax.f32 %v2740_v62, 0.0 }
 0x271   : > { %v1631_v25 = vpack.c.bf16 %v1602_v0, %v1601_v11  ;;  %v1639_v11 = vpack.c.bf16 %v1618_v61, %v1617_v55  ;;  %v1623_v0 = vmax.f32 %v2722_v50, 0.0  ;;  %v1640_v17 = vpack.c.bf16 %v1620_v5, %v1619_v63 }
 0x272   : > { %v1626_v21 = vmax.f32 %v2743_v1, 0.0  ;;  %v1644_v31 = vpack.c.bf16 %v1628_v27, %v1627_v23 }
 0x273   : > { %1652 = vst [vmem:[%s2760_s25 + $0x10] sm:$0xff] %v1631_v25  ;;  %1660 = vst [vmem:[%s2760_s25 + $0x50] sm:$0xff] %v1639_v11  ;;  %v1642_v25 = vpack.c.bf16 %v1624_v13, %v1623_v0 }
 0x274   : > { %1661 = vst [vmem:[%s2760_s25 + $0x58] sm:$0xff] %v1640_v17  ;;  %v1643_v29 = vpack.c.bf16 %v1626_v21, %v1625_v15  ;;  %1665 = vst [vmem:[%s2760_s25 + $0x78] sm:$0xff] %v1644_v31 }
 0x275   : > { %1663 = vst [vmem:[%s2760_s25 + $0x68] sm:$0xff] %v1642_v25 }
 0x276   : > { %1664 = vst [vmem:[%s2760_s25 + $0x70] sm:$0xff] %v1643_v29 }
 0x277 PF: > { %p1900_p11 = scmp.ne.s32.totalorder %s2317_s18, 2 }
 0x278   : > { %1670 = vst [vmem:[%s2941_s5] sm:$0xff] (!%p1900_p11), %v2653_v4  ;;  %1671 = vst [vmem:[%s2941_s5 + $0x8] sm:$0xff] (!%p1900_p11), %v2659_v8 }
 0x279   : > { %1669 = sbr.rel (%p1900_p11) target bundleno = 648 (0x288), region = 60  ;;  %1672 = vst [vmem:[%s2941_s5 + $0x10] sm:$0xff] (!%p1900_p11), %v2650_v2  ;;  %1673 = vst [vmem:[%s2941_s5 + $0x18] sm:$0xff] (!%p1900_p11), %v2656_v6 }
 0x27a   : > { %1674 = vst [vmem:[%s2941_s5 + $0x20] sm:$0xff] (!%p1900_p11), %v2665_v12  ;;  %1675 = vst [vmem:[%s2941_s5 + $0x28] sm:$0xff] (!%p1900_p11), %v2671_v16 }
 0x27b   : > { %1676 = vst [vmem:[%s2941_s5 + $0x30] sm:$0xff] (!%p1900_p11), %v2662_v10  ;;  %1677 = vst [vmem:[%s2941_s5 + $0x38] sm:$0xff] (!%p1900_p11), %v2668_v14 }
 0x27c   : > { %1678 = vst [vmem:[%s2941_s5 + $0x40] sm:$0xff] (!%p1900_p11), %v2677_v20  ;;  %1679 = vst [vmem:[%s2941_s5 + $0x48] sm:$0xff] (!%p1900_p11), %v2683_v24 }
 0x27d   : > { %1680 = vst [vmem:[%s2941_s5 + $0x50] sm:$0xff] (!%p1900_p11), %v2674_v18  ;;  %1681 = vst [vmem:[%s2941_s5 + $0x58] sm:$0xff] (!%p1900_p11), %v2680_v22 }
 0x27e   : > { %1682 = vst [vmem:[%s2941_s5 + $0x60] sm:$0xff] (!%p1900_p11), %v2689_v28  ;;  %1683 = vst [vmem:[%s2941_s5 + $0x68] sm:$0xff] (!%p1900_p11), %v2695_v32 }
 0x27f   : > { %1684 = vst [vmem:[%s2941_s5 + $0x70] sm:$0xff] (!%p1900_p11), %v2686_v26  ;;  %1685 = vst [vmem:[%s2941_s5 + $0x78] sm:$0xff] (!%p1900_p11), %v2692_v30 }
 0x280   : > { %1686 = vst [vmem:[%s2941_s5 + $0x80] sm:$0xff] %v2701_v36  ;;  %1687 = vst [vmem:[%s2941_s5 + $0x88] sm:$0xff] %v2707_v40 }
 0x281   : > { %1688 = vst [vmem:[%s2941_s5 + $0x90] sm:$0xff] %v2698_v34  ;;  %1689 = vst [vmem:[%s2941_s5 + $0x98] sm:$0xff] %v2704_v38 }
 0x282   : > { %1690 = vst [vmem:[%s2941_s5 + $0xa0] sm:$0xff] %v2713_v44  ;;  %1691 = vst [vmem:[%s2941_s5 + $0xa8] sm:$0xff] %v2719_v48 }
 0x283   : > { %1692 = vst [vmem:[%s2941_s5 + $0xb0] sm:$0xff] %v2710_v42  ;;  %1693 = vst [vmem:[%s2941_s5 + $0xb8] sm:$0xff] %v2716_v46 }
 0x284   : > { %1694 = vst [vmem:[%s2941_s5 + $0xc0] sm:$0xff] %v2725_v52  ;;  %1695 = vst [vmem:[%s2941_s5 + $0xc8] sm:$0xff] %v2731_v56 }
 0x285   : > { %1696 = vst [vmem:[%s2941_s5 + $0xd0] sm:$0xff] %v2722_v50  ;;  %1697 = vst [vmem:[%s2941_s5 + $0xd8] sm:$0xff] %v2728_v54 }
 0x286   : > { %1698 = vst [vmem:[%s2941_s5 + $0xe0] sm:$0xff] %v2737_v60  ;;  %1699 = vst [vmem:[%s2941_s5 + $0xe8] sm:$0xff] %v2743_v1 }
 0x287   : > { %1700 = vst [vmem:[%s2941_s5 + $0xf0] sm:$0xff] %v2734_v58  ;;  %1701 = vst [vmem:[%s2941_s5 + $0xf8] sm:$0xff] %v2740_v62 }
 0x288 PF: > { %s15_s20 = sadd.s32 1, %s2325_s20   ;;  %s2942_s18 = smov %s2321_s19 }
 0x289   : > { %p12_p12 = scmp.ge.s32.totalorder %s15_s20, 5   ;;  %s2943_s19 = smov %s2945_s21 }
 0x28b   :  { %14 = sbr.rel (!%p12_p12) target bundleno = 2 (0x2), region = 104 }

</bundles_post_ra>
